<compile_context>
chip_gen: v6e
topology: v6e:2x2x1
jax: 0.10.0
libtpu: 0.0.40
codegen_flags: <defaults>
</compile_context>

<pallas_src>
import math

import jax
import jax.numpy as jnp
from jax.experimental import pallas as pl
from jax.experimental.pallas import tpu as pltpu


def _copy_kernel(x_ref, o_ref):
    # Straight VMEM tile copy (no arithmetic).
    o_ref[...] = x_ref[...]


_LANE = 128
# Lane-dense slab widths to try (largest first); all multiples of 128.
_SLAB_WIDTHS = (32768, 16384, 8192, 4096, 2048, 1024, 512, 256, 128)


def _sublane_multiple(dtype) -> int:
    # f32 -> 8 sublanes, bf16 -> 16, int8/fp8 -> 32 (packed layouts).
    itemsize = jnp.dtype(dtype).itemsize
    return 8 * max(1, 4 // max(itemsize, 1))


def _hw_params():
    """Generation-aware (per-block byte budget, scoped-VMEM limit)."""
    vmem_cap = 128 << 20
    try:
        info = pltpu.get_tpu_info()
        vmem_cap = int(getattr(info, "vmem_capacity_bytes", vmem_cap))
    except Exception:
        pass
    if vmem_cap <= (64 << 20):
        # v7x-class: 64 MiB physical VMEM per TensorCore -> leave headroom.
        return 4 << 20, 32 << 20
    # v5e / v6e: 128 MiB physical VMEM.
    return 8 << 20, 64 << 20


def _largest_aligned_divisor(n: int, align: int, cap: int) -> int:
    """Largest multiple of `align` that divides n and is <= cap (0 if none)."""
    top = min(cap, n) // align
    for k in range(top, 0, -1):
        b = k * align
        if n % b == 0:
            return b
    return 0


def _plan_blocks(R: int, C: int, dtype, budget: int):
    """Pick (block_rows, block_cols) for copying an (R, C) array."""
    itemsize = jnp.dtype(dtype).itemsize
    sub = _sublane_multiple(dtype)

    # --- columns: full width if a sub-row-high slice fits, else 128-tiles ---
    if C * itemsize * sub <= budget:
        bc = C
    else:
        target = max(_LANE, (budget // (sub * itemsize)) // _LANE * _LANE)
        bc = _largest_aligned_divisor(C, _LANE, target) or target

    # --- rows: whole slab if it fits, else sub-aligned divisor of R ---------
    if R * bc * itemsize <= budget:
        br = R
    else:
        max_rows = max(sub, (budget // (bc * itemsize)) // sub * sub)
        br = _largest_aligned_divisor(R, sub, max_rows) or min(max_rows, R)

    # --- guarantee >= 2 grid steps so both v7x TensorCores get work ---------
    if pl.cdiv(R, br) * pl.cdiv(C, bc) == 1:
        if br >= 2 * sub:
            br = max(sub, (br // 2) // sub * sub)
        elif bc >= 2 * _LANE:
            bc = max(_LANE, (bc // 2) // _LANE * _LANE)

    return br, bc


def _pallas_copy_2d(x2, budget: int, vmem_limit: int):
    """Tiled, lane-dense Pallas copy of a 2-D array."""
    R, C = x2.shape
    itemsize = jnp.dtype(x2.dtype).itemsize
    br, bc = _plan_blocks(R, C, x2.dtype, budget)
    grid = (pl.cdiv(R, br), pl.cdiv(C, bc))
    return pl.pallas_call(
        _copy_kernel,
        out_shape=jax.ShapeDtypeStruct((R, C), x2.dtype),
        grid=grid,
        in_specs=[pl.BlockSpec((br, bc), lambda i, j: (i, j))],
        out_specs=pl.BlockSpec((br, bc), lambda i, j: (i, j)),
        compiler_params=pltpu.CompilerParams(
            dimension_semantics=("parallel", "parallel"),
            vmem_limit_bytes=vmem_limit,
        ),
        cost_estimate=pl.CostEstimate(
            flops=0,
            transcendentals=0,
            bytes_accessed=2 * R * C * itemsize,
        ),
    )(x2)


@jax.jit
def _flatten_pallas(x):
    n = x.shape[0]
    d = math.prod(x.shape[1:])
    total = n * d
    budget, vmem_limit = _hw_params()

    # Lane-dense slab decoupled from the logical d: biggest measured lever
    # (unmasked full-width vector stores regardless of d).
    slab_c = next((c for c in _SLAB_WIDTHS if total % c == 0), 0)
    if slab_c:
        slab = jnp.reshape(x, (total // slab_c, slab_c))
        out = _pallas_copy_2d(slab, budget, vmem_limit)
        return jnp.reshape(out, (n, d))

    # total not a multiple of 128: fall back to the logical (n, d) layout
    # (masked tail stores; only reachable for odd shapes under force_pallas).
    x2 = jnp.reshape(x, (n, d))
    return _pallas_copy_2d(x2, budget, vmem_limit)


def flatten(x, *, force_pallas: bool = False):
    """Equivalent of `x.view(-1, prod(x.shape[1:]))`."""
    if force_pallas:
        return _flatten_pallas(x)
    # Production path: a row-major flatten is metadata-only; XLA performs it
    # as a free bitcast, so never launch a copy kernel here.
    n = x.shape[0]
    d = math.prod(x.shape[1:])
    return jnp.reshape(x, (n, d))


if __name__ == "__main__":
    key = jax.random.PRNGKey(0)
    k1, k2 = jax.random.split(key)

    # Small NCHW feature map consistent with the module's typical use.
    x = jax.random.normal(k1, (2, 4, 16, 16), dtype=jnp.float32)
    ref = jnp.reshape(x, (x.shape[0], -1))

    # Production path: metadata-only reshape, no kernel launch.
    y = jax.block_until_ready(flatten(x))
    assert y.shape == (2, 4 * 16 * 16) and y.dtype == x.dtype
    assert bool(jnp.array_equal(y, ref))

    # Pallas path on the small input (lane-dense slab, grid split in columns).
    y_pallas = jax.block_until_ready(flatten(x, force_pallas=True))
    assert y_pallas.shape == ref.shape and y_pallas.dtype == x.dtype
    assert bool(jnp.array_equal(y_pallas, ref))

    # Moderately larger input: exercises the multi-step slab tiling path.
    xb = jax.random.normal(k2, (256, 4, 16, 16), dtype=jnp.float32)
    refb = jnp.reshape(xb, (xb.shape[0], -1))
    yb = jax.block_until_ready(flatten(xb, force_pallas=True))
    assert yb.shape == (256, 1024) and bool(jnp.array_equal(yb, refb))

    # Odd trailing size (d % 128 != 0): exercises the (n, d) fallback layout.
    xo = jax.random.normal(k1, (16, 3, 5, 7), dtype=jnp.float32)
    refo = jnp.reshape(xo, (xo.shape[0], -1))
    yo = jax.block_until_ready(flatten(xo, force_pallas=True))
    assert yo.shape == (16, 105) and bool(jnp.array_equal(yo, refo))

    print("KERNEL_OK")
</pallas_src>

<mosaic_0001>
module attributes {stable_mosaic.version = 11 : i64} {
  func.func @_copy_kernel(%arg0: i32, %arg1: i32, %arg2: memref<1x1024xf32, #tpu.memory_space<vmem>>, %arg3: memref<1x1024xf32, #tpu.memory_space<vmem>>) attributes {dimension_semantics = [#tpu.dimension_semantics<parallel>, #tpu.dimension_semantics<parallel>], iteration_bounds = array<i64: 1, 2>, scalar_prefetch = 0 : i64, scratch_operands = 0 : i64, tpu.core_type = #tpu.core_type<tc>, window_params = [{transform_indices = @transform_0, window_bounds = array<i64: 1, 1024>}, {transform_indices = @transform_1, window_bounds = array<i64: 1, 1024>}]} {
    %c0 = arith.constant 0 : index
    %c0_0 = arith.constant 0 : index
    %0 = vector.load %arg2[%c0, %c0_0] : memref<1x1024xf32, #tpu.memory_space<vmem>>, vector<1x1024xf32>
    %c0_1 = arith.constant 0 : index
    %c0_2 = arith.constant 0 : index
    %1 = vector.load %arg3[%c0_1, %c0_2] : memref<1x1024xf32, #tpu.memory_space<vmem>>, vector<1x1024xf32>
    tpu.vector_store %arg3[%c0_1, %c0_2], %0 {strides = array<i32>} : memref<1x1024xf32, #tpu.memory_space<vmem>>, vector<1x1024xf32>,
    return
  }
  func.func @transform_0(%arg0: i32, %arg1: i32) -> (i32, i32) {
    %c0_i32 = arith.constant 0 : i32
    return %arg0, %arg1 : i32, i32
  }
  func.func @transform_1(%arg0: i32, %arg1: i32) -> (i32, i32) {
    %c0_i32 = arith.constant 0 : i32
    return %arg0, %arg1 : i32, i32
  }
}

</mosaic_0001>

<bundles_post_ra>
// kernel: _flatten_pallas.1
= control target key start
LH: loop header
LB: loop body
LE: loop exit
PB: predicated region body
PF: predicated region fallthrough
CT: control target
= control target key end

     0   :  { %s276_s6 = smov 0   ;;  %s280_s7 = smov 0   ;;  %s304_s0 = inlined_call_operand.vmem [shape: f32[1,2048], index: 0, kind: input, shape index: {}]   ;;  %s305_s1 = inlined_call_operand.vmem [shape: f32[1,2048], index: 1, kind: output, shape index: {}]  }
   0x1   :  { %s284_s8 = smov 0  }
   0x2 LB: > { %s20_s9 = sadd.s32 1, %s282_s7  ;;  %p235_p0 = scmp.ge.s32.totalorder %s286_s8, 1  ;;  %s286_s8 = sphi %s284_s8, %s11_s8   ;;  %s282_s7 = sphi %s280_s7, %s281_s7   ;;  %s278_s6 = sphi %s276_s6, %s277_s6  }
   0x3   : > { %p21_p1 = scmp.ge.s32.totalorder %s20_s9, 2  ;;  %p107_p2 = scmp.lt.s32.totalorder %s286_s8, 3 }
   0x5   : > { %s307_s9 = smov (%p21_p1, %s20_s9), 0  ;;  %p108_p3 = pnand %p235_p0, %p107_p2 }
   0x6   : > { %s236_s10 = sshll.u32 (!%p108_p3), %s278_s6, 3 }
   0x7   : > { %111 = sbr.rel (%p108_p3) target bundleno = 16 (0x10), region = 24  ;;  %p136_p4 = scmp.lt.s32.totalorder (!%p108_p3), %s236_s10, 15 }
   0xc   : > { %s309_s10 = smov (!%p136_p4, %s236_s10), 15 }
   0xd   : > { %s140_s13 = scalar_lea.vmem %s304_s0, %s309_s10  ;;  %s149_s16 = scalar_lea.vmem %s305_s1, %s309_s10 }
   0xe   : > { %v151_v0 = vld [vmem:[%s140_s13] sm:$0xff] }
   0xf   : > { %152 = vst [vmem:[%s149_s16] sm:$0xff] %v151_v0 }
  0x10 PF: > { %s11_s8 = sadd.s32 1, %s286_s8   ;;  %s277_s6 = smov %s282_s7  }
  0x11   : > { %p8_p5 = scmp.ge.s32.totalorder %s11_s8, 4   ;;  %s281_s7 = smov %s307_s9  }
  0x13   :  { %10 = sbr.rel (!%p8_p5) target bundleno = 2 (0x2), region = 54 }

</bundles_post_ra>
